<compile_context>
chip_gen: v6e
topology: v6e:2x2x1
jax: 0.10.0
libtpu: 0.0.40
codegen_flags: <defaults>
</compile_context>

<pallas_src>
import numpy as np
import jax
import jax.numpy as jnp
from jax import lax
from jax.experimental import pallas as pl
from jax.experimental.pallas import tpu as pltpu

EPS_BN = 1e-5
NUM_STEPS = 1        # PWGGNN num_steps (SERecLayer default)
NUM_WMAT = 11        # stacked (D, D) weight matrices
NUM_VVEC = 13        # stacked (1, D) vectors (biases / BN affine / PReLU slopes)

# bf16 MXU operands only on a real TPU backend; elsewhere (CPU / interpret
# sandbox) fall back to f32 so every dot is a supported element-type combo.
_ON_TPU = jax.default_backend() == "tpu"
MXU_DTYPE = jnp.bfloat16 if _ON_TPU else jnp.float32


def _vmem_capacity_bytes():
    if _ON_TPU:
        try:
            return int(pltpu.get_tpu_info().vmem_capacity_bytes)
        except Exception:
            pass
    return 128 << 20


# ----------------------------- shared math -----------------------------------
def _bn_train(x, gamma, beta):
    """nn.BatchNorm1d, training mode: batch stats, biased variance (single pass)."""
    n = x.shape[0]
    s1 = jnp.sum(x, axis=0, keepdims=True)
    s2 = jnp.sum(x * x, axis=0, keepdims=True)
    mu = s1 * (1.0 / n)
    var = s2 * (1.0 / n) - mu * mu
    return (x - mu) * lax.rsqrt(var + EPS_BN) * gamma + beta


def _prelu(x, slope):
    return jnp.where(x >= 0, x, x * slope)


def _dot(a, b):
    return jnp.dot(a, b, preferred_element_type=jnp.float32)


def _dot_t(a, b):
    """a.T @ b without materializing the transpose (lhs contracting dim 0)."""
    return lax.dot_general(a, b, (((0,), (0,)), ((), ())),
                           preferred_element_type=jnp.float32)


# ------------------------------- Pallas kernel --------------------------------
def serec_kernel(w_ref, wt_ref, feat_ref, featu_ref, s_ref, l_ref,
                 invin_ref, invout_ref, logcnt_ref,
                 wio_ref, wgate_ref, wro_ref, we_ref,
                 b2_ref, v1_ref, out_ref):
    D = feat_ref.shape[1]
    mxu = wio_ref.dtype            # bf16 on TPU, f32 elsewhere

    feat = feat_ref[...]           # (N, D) f32
    feat_u = featu_ref[...]        # (B, D) f32
    S = s_ref[...]                 # (B, N) f32 (membership mask)
    L = l_ref[...].astype(mxu)     # (B, N) one-hot last-node selector (exact in bf16)
    inv_in = invin_ref[...]        # (N, 1) f32   1/in_deg  (1 where deg == 0)
    inv_out = invout_ref[...]      # (N, 1) f32   1/out_deg

    W_io = wio_ref[...]            # (D, 2D)  [w_in | w_out]
    W_gate = wgate_ref[...]        # (3D, 2D) rows [a_in; a_out; h] -> cols [i_i | i_n]
    w_user = wro_ref[0]
    w_key = wro_ref[1]
    w_last = wro_ref[2]
    w_e = we_ref[...]              # (D, 1)
    b_io = b2_ref[0]               # (1, 2D)  [b_in  | b_out]
    b_x = b2_ref[1]                # (1, 2D)  [bx_ii | bx_in]
    bn1_g = v1_ref[0]; bn1_b = v1_ref[1]; prelu_gnn = v1_ref[2]
    bni_g = v1_ref[3]; bni_b = v1_ref[4]
    bnu_g = v1_ref[5]; bnu_b = v1_ref[6]
    b_user = v1_ref[7]; prelu_ro = v1_ref[8]

    # ---- PWGGNN: BatchNorm -> num_steps gated propagation -> PReLU ----
    # fc_i2h / fc_h2o are None (dims equal).  Element-wise math stays f32.
    h = _bn_train(feat, bn1_g, bn1_b)
    # TODO(synk): if NUM_STEPS > 1, switch to lax.fori_loop(..., unroll=True).
    for _ in range(NUM_STEPS):
        # Fused fc_in | fc_out.  (Lane slices below are free when D % 128 == 0.)
        f = (_dot(h.astype(mxu), W_io) + b_io).astype(mxu)       # (N, 2D)
        # a_in[v]  = (1/in_deg[v])  * sum_u W[u,v] f_in[u]   (u_mul_e_sum on g)
        # a_out[u] = (1/out_deg[u]) * sum_v W[u,v] f_out[v]  (u_mul_e_sum on rg)
        a_in = inv_in * _dot(wt_ref[...], f[:, :D])              # (N, D) f32
        a_out = inv_out * _dot(w_ref[...], f[:, D:])             # (N, D) f32
        # UpdateCell: single fused matmul, contraction depth 3D.
        x3 = jnp.concatenate([a_in.astype(mxu), a_out.astype(mxu),
                              h.astype(mxu)], axis=1)            # (N, 3D)
        gates = _dot(x3, W_gate) + b_x                           # (N, 2D) f32
        input_gate = jax.nn.sigmoid(gates[:, :D])
        new_gate = jnp.tanh(gates[:, D:])
        h = new_gate + input_gate * (h - new_gate)
    feat_gnn = _prelu(h, prelu_gnn)                              # nn.PReLU(D)

    # ---- ct_l = feat[last_nodes] (one-hot gather on the MXU) ----
    ct_l = _dot(L, feat_gnn.astype(mxu))                         # (B, D)

    # ---- PAttentionReadout ----
    fi = _bn_train(feat_gnn, bni_g, bni_b)
    fu = _bn_train(feat_u, bnu_g, bnu_b)
    fi_m = fi.astype(mxu)
    feat_key = _dot(fi_m, w_key)                                 # (N, D)
    last_i = _dot(L, fi_m)                                       # (B, D) = fi[last]
    q = _dot(fu.astype(mxu), w_user) + b_user + _dot(last_i.astype(mxu), w_last)
    feat_qry = _dot_t(S.astype(mxu), q.astype(mxu))              # broadcast_nodes (N, D)
    z = jax.nn.sigmoid(feat_qry + feat_key)                      # (N, D) f32
    # attention logits: (N,1) column, then transpose only that column to (1,N)
    e_col = _dot(z.astype(mxu), w_e)                             # (N, 1)
    e_row = jnp.transpose(e_col) + logcnt_ref[...]               # (1, N)  + log(cnt)
    # segment softmax + segment_reduce('sum'), all in (B, N) lane-dense layout
    masked = jnp.where(S > 0, e_row, -1e30)                      # (B, N)
    seg_max = jnp.max(masked, axis=1, keepdims=True)             # (B, 1)
    ex = jnp.exp(masked - seg_max)                               # (B, N)
    seg_sum = jnp.sum(ex, axis=1, keepdims=True)                 # (B, 1)
    alpha = ex * (1.0 / seg_sum)                                 # exact reciprocal
    rst = _dot(alpha.astype(mxu), fi_m)                          # (B, D)
    ct_g = _prelu(rst, prelu_ro)

    # th.cat((ct_l, ct_g), dim=1) written directly into one (B, 2D) slab
    out_ref[:, :D] = ct_l
    out_ref[:, D:] = ct_g


# ------------------------------- wrapper ---------------------------------------
@jax.jit
def serec_layer(W, feat, feat_u, S, L, cnt, wstack, vstack, W_e):
    N, D = feat.shape
    B = feat_u.shape[0]

    (w_in, w_out, wx_ii_a, wx_ii_b, wx_in_a, wx_in_b,
     wh_i, wh_n, w_user, w_key, w_last) = [wstack[i] for i in range(NUM_WMAT)]
    (bn1_g, bn1_b, b_in, b_out, bx_ii, bx_in, prelu_gnn,
     bni_g, bni_b, bnu_g, bnu_b, b_user, prelu_ro) = [vstack[i] for i in range(NUM_VVEC)]

    # Degree normalization folded into per-row reciprocal scales (precomputed
    # here, outside the kernel), matching F.e_div_v semantics.
    in_deg = jnp.sum(W, axis=0)
    out_deg = jnp.sum(W, axis=1)
    inv_in = (1.0 / jnp.where(in_deg > 0.0, in_deg, 1.0)).reshape(N, 1)
    inv_out = (1.0 / jnp.where(out_deg > 0.0, out_deg, 1.0)).reshape(N, 1)
    log_cnt = jnp.log(cnt).reshape(1, N)

    # Adjacency and its transpose in the MXU dtype: every adjacency matmul in
    # the kernel is the untransposed fast path; f32 accumulation stays in-kernel.
    W_m = W.astype(MXU_DTYPE)
    WT_m = W.T.astype(MXU_DTYPE)
    # TODO(synk): on v7x (64 MiB VMEM) drop WT_m (transposed-LHS dot_general on
    # W_m) or stream W / W^T row tiles with a pipelined grid + per-graph
    # megacore split (BN stats must then be computed in a prologue); at these
    # shapes a single VMEM-resident call is fastest.

    # Fused per-step weights (shipped in MXU dtype).
    w_io = jnp.concatenate([w_in, w_out], axis=1).astype(MXU_DTYPE)        # (D, 2D)
    w_gate = jnp.concatenate([
        jnp.concatenate([wx_ii_a, wx_in_a], axis=1),   # a_in  rows
        jnp.concatenate([wx_ii_b, wx_in_b], axis=1),   # a_out rows
        jnp.concatenate([wh_i, wh_n], axis=1),         # h     rows
    ], axis=0).astype(MXU_DTYPE)                                           # (3D, 2D)
    w_ro = jnp.stack([w_user, w_key, w_last]).astype(MXU_DTYPE)            # (3, D, D)
    w_e_m = W_e.reshape(D, 1).astype(MXU_DTYPE)                            # (D, 1)
    b2 = jnp.stack([jnp.concatenate([b_in, b_out], axis=1),
                    jnp.concatenate([bx_ii, bx_in], axis=1)])              # (2, 1, 2D) f32
    v1 = jnp.stack([bn1_g, bn1_b, prelu_gnn, bni_g, bni_b,
                    bnu_g, bnu_b, b_user, prelu_ro])                       # (9, 1, D) f32

    vmem = pl.BlockSpec(memory_space=pltpu.MemorySpace.VMEM)
    mxu_bytes = 2 if MXU_DTYPE == jnp.bfloat16 else 4
    vmem_need = (2 * N * N * mxu_bytes                     # W_m + WT_m
                 + 40 * N * D * 4                          # (N,D)/(N,2D)/(N,3D) temps
                 + 8 * B * N * 4
                 + (w_io.size + w_gate.size + w_ro.size + w_e_m.size) * mxu_bytes
                 + (b2.size + v1.size) * 4
                 + (4 << 20))                              # headroom
    cap = _vmem_capacity_bytes()
    vmem_limit = int(min(max(vmem_need, 16 << 20), cap - (8 << 20)))

    return pl.pallas_call(
        serec_kernel,
        out_shape=jax.ShapeDtypeStruct((B, 2 * D), jnp.float32),
        in_specs=[vmem] * 15,
        out_specs=vmem,
        compiler_params=pltpu.CompilerParams(vmem_limit_bytes=vmem_limit),
    )(W_m, WT_m, feat, feat_u, S, L, inv_in, inv_out, log_cnt,
      w_io, w_gate, w_ro, w_e_m, b2, v1)


# ------------------------- pure-JAX f32 reference ------------------------------
def _serec_reference(W, feat, feat_u, S, L, cnt, wstack, vstack, W_e):
    (w_in, w_out, wx_ii_a, wx_ii_b, wx_in_a, wx_in_b,
     wh_i, wh_n, w_user, w_key, w_last) = [wstack[i] for i in range(NUM_WMAT)]
    (bn1_g, bn1_b, b_in, b_out, bx_ii, bx_in, prelu_gnn,
     bni_g, bni_b, bnu_g, bnu_b, b_user, prelu_ro) = [vstack[i] for i in range(NUM_VVEC)]
    S_T = S.T

    in_deg = jnp.sum(W, axis=0, keepdims=True)
    out_deg = jnp.sum(W, axis=1, keepdims=True)
    A_in = W / jnp.where(in_deg > 0, in_deg, 1.0)
    A_out = W / jnp.where(out_deg > 0, out_deg, 1.0)

    h = _bn_train(feat, bn1_g, bn1_b)
    for _ in range(NUM_STEPS):
        f_in = h @ w_in + b_in
        f_out = h @ w_out + b_out
        a_in = A_in.T @ f_in
        a_out = A_out @ f_out
        i_i = a_in @ wx_ii_a + a_out @ wx_ii_b + bx_ii
        i_n = a_in @ wx_in_a + a_out @ wx_in_b + bx_in
        h_i = h @ wh_i
        h_n = h @ wh_n
        input_gate = jax.nn.sigmoid(i_i + h_i)
        new_gate = jnp.tanh(i_n + h_n)
        h = new_gate + input_gate * (h - new_gate)
    feat_gnn = _prelu(h, prelu_gnn)

    ct_l = L @ feat_gnn

    fi = _bn_train(feat_gnn, bni_g, bni_b)
    fu = _bn_train(feat_u, bnu_g, bnu_b)
    feat_val = fi
    feat_key = fi @ w_key
    fu2 = fu @ w_user + b_user
    feat_last = (L @ fi) @ w_last
    feat_qry = S_T @ (fu2 + feat_last)
    e = jax.nn.sigmoid(feat_qry + feat_key) @ W_e
    e = e + jnp.log(cnt)
    masked = jnp.where(S_T > 0, e, -1e30)
    seg_max = jnp.max(masked, axis=0, keepdims=True)
    m_node = jnp.sum(S_T * seg_max, axis=1, keepdims=True)
    ex = jnp.exp(e - m_node)
    seg_sum = jnp.sum(S_T * ex, axis=0, keepdims=True)
    denom_node = jnp.sum(S_T * seg_sum, axis=1, keepdims=True)
    alpha = ex / denom_node
    rst = S @ (alpha * feat_val)
    ct_g = _prelu(rst, prelu_ro)
    return jnp.concatenate([ct_l, ct_g], axis=1)


# ---------------------------------- main ---------------------------------------
if __name__ == "__main__":
    key = jax.random.PRNGKey(0)
    ks = iter(jax.random.split(key, 32))

    B, D = 2, 32
    sizes = [7, 9]                 # nodes per session graph
    N = sum(sizes)

    # --- batched chain session graphs: node i -> i+1 within each graph ---
    W_np = np.zeros((N, N), np.float32)
    seg = np.zeros((B, N), np.float32)
    last_idx = []
    off = 0
    for b, n in enumerate(sizes):
        for i in range(n - 1):
            W_np[off + i, off + i + 1] = 1.0
        seg[b, off:off + n] = 1.0
        last_idx.append(off + n - 1)
        off += n
    wvals = np.asarray(jax.random.uniform(next(ks), (N, N), minval=0.5, maxval=2.0))
    W_np = W_np * wvals
    # a few extra intra-graph "revisit" edges
    W_np[1, 3] = 1.3; W_np[4, 2] = 0.7
    W_np[8, 11] = 0.9; W_np[12, 9] = 1.1

    W = jnp.asarray(W_np)
    S = jnp.asarray(seg)
    L_np = np.zeros((B, N), np.float32)
    for b, li in enumerate(last_idx):
        L_np[b, li] = 1.0
    L = jnp.asarray(L_np)
    cnt = jnp.asarray(1.0 + (np.arange(N) % 3).astype(np.float32)).reshape(N, 1)

    feat = jax.random.normal(next(ks), (N, D), jnp.float32)
    feat_u = jax.random.normal(next(ks), (B, D), jnp.float32)

    # --- deterministic synthetic parameters ---
    def mat(k):
        return (jax.random.normal(k, (D, D), jnp.float32) / np.sqrt(D)).astype(jnp.float32)

    def vec(k, scale=0.1):
        return scale * jax.random.normal(k, (1, D), jnp.float32)

    # order: fc_in, fc_out, x2i[a_in->i_i], x2i[a_out->i_i], x2i[a_in->i_n],
    #        x2i[a_out->i_n], h2h[->h_i], h2h[->h_n], fc_user, fc_key, fc_last
    wstack = jnp.stack([mat(next(ks)) for _ in range(NUM_WMAT)])       # (11, D, D)

    bn1_g = 1.0 + vec(next(ks)); bn1_b = vec(next(ks))
    b_in = vec(next(ks)); b_out = vec(next(ks))
    bx_ii = vec(next(ks)); bx_in = vec(next(ks))
    prelu_gnn = jnp.full((1, D), 0.25, jnp.float32)   # nn.PReLU default init
    bni_g = 1.0 + vec(next(ks)); bni_b = vec(next(ks))
    bnu_g = 1.0 + vec(next(ks)); bnu_b = vec(next(ks))
    b_user = vec(next(ks))
    prelu_ro = jnp.full((1, D), 0.25, jnp.float32)
    vstack = jnp.stack([bn1_g, bn1_b, b_in, b_out, bx_ii, bx_in, prelu_gnn,
                        bni_g, bni_b, bnu_g, bnu_b, b_user, prelu_ro])  # (13, 1, D)
    W_e = jax.random.normal(next(ks), (D, 1), jnp.float32) / np.sqrt(D)

    # --- run the Pallas kernel ---
    sr = serec_layer(W, feat, feat_u, S, L, cnt, wstack, vstack, W_e)
    sr = jax.block_until_ready(sr)

    # --- pure-JAX f32 reference check ---
    with jax.default_matmul_precision("float32"):
        ref = _serec_reference(W, feat, feat_u, S, L, cnt, wstack, vstack, W_e)

    assert sr.shape == (B, 2 * D)
    assert np.all(np.isfinite(np.asarray(sr)))
    np.testing.assert_allclose(np.asarray(sr), np.asarray(ref), rtol=2e-2, atol=2e-2)
    print("KERNEL_OK")
</pallas_src>

<mosaic_0001>
module attributes {stable_mosaic.version = 11 : i64} {
  func.func @serec_kernel(%arg0: memref<16x16xf32, #tpu.memory_space<vmem>>, %arg1: memref<16x16xf32, #tpu.memory_space<vmem>>, %arg2: memref<16x32xf32, #tpu.memory_space<vmem>>, %arg3: memref<2x32xf32, #tpu.memory_space<vmem>>, %arg4: memref<2x16xf32, #tpu.memory_space<vmem>>, %arg5: memref<2x16xf32, #tpu.memory_space<vmem>>, %arg6: memref<16x1xf32, #tpu.memory_space<vmem>>, %arg7: memref<16x1xf32, #tpu.memory_space<vmem>>, %arg8: memref<1x16xf32, #tpu.memory_space<vmem>>, %arg9: memref<32x64xf32, #tpu.memory_space<vmem>>, %arg10: memref<96x64xf32, #tpu.memory_space<vmem>>, %arg11: memref<3x32x32xf32, #tpu.memory_space<vmem>>, %arg12: memref<32x1xf32, #tpu.memory_space<vmem>>, %arg13: memref<2x1x64xf32, #tpu.memory_space<vmem>>, %arg14: memref<9x1x32xf32, #tpu.memory_space<vmem>>, %arg15: memref<2x64xf32, #tpu.memory_space<vmem>>) attributes {dimension_semantics = [], scalar_prefetch = 0 : i64, scratch_operands = 0 : i64, tpu.core_type = #tpu.core_type<tc>} {
    %c0 = arith.constant 0 : index
    %c0_0 = arith.constant 0 : index
    %0 = vector.load %arg2[%c0, %c0_0] : memref<16x32xf32, #tpu.memory_space<vmem>>, vector<16x32xf32>
    %c0_1 = arith.constant 0 : index
    %c0_2 = arith.constant 0 : index
    %1 = vector.load %arg3[%c0_1, %c0_2] : memref<2x32xf32, #tpu.memory_space<vmem>>, vector<2x32xf32>
    %c0_3 = arith.constant 0 : index
    %c0_4 = arith.constant 0 : index
    %2 = vector.load %arg4[%c0_3, %c0_4] : memref<2x16xf32, #tpu.memory_space<vmem>>, vector<2x16xf32>
    %c0_5 = arith.constant 0 : index
    %c0_6 = arith.constant 0 : index
    %3 = vector.load %arg5[%c0_5, %c0_6] : memref<2x16xf32, #tpu.memory_space<vmem>>, vector<2x16xf32>
    %c0_7 = arith.constant 0 : index
    %c0_8 = arith.constant 0 : index
    %4 = vector.load %arg6[%c0_7, %c0_8] : memref<16x1xf32, #tpu.memory_space<vmem>>, vector<16x1xf32>
    %c0_9 = arith.constant 0 : index
    %c0_10 = arith.constant 0 : index
    %5 = vector.load %arg7[%c0_9, %c0_10] : memref<16x1xf32, #tpu.memory_space<vmem>>, vector<16x1xf32>
    %c0_11 = arith.constant 0 : index
    %c0_12 = arith.constant 0 : index
    %6 = vector.load %arg9[%c0_11, %c0_12] : memref<32x64xf32, #tpu.memory_space<vmem>>, vector<32x64xf32>
    %c0_13 = arith.constant 0 : index
    %c0_14 = arith.constant 0 : index
    %7 = vector.load %arg10[%c0_13, %c0_14] : memref<96x64xf32, #tpu.memory_space<vmem>>, vector<96x64xf32>
    %c0_15 = arith.constant 0 : index
    %c0_16 = arith.constant 0 : index
    %c0_17 = arith.constant 0 : index
    %8 = vector.load %arg11[%c0_15, %c0_16, %c0_17] : memref<3x32x32xf32, #tpu.memory_space<vmem>>, vector<1x32x32xf32>
    %9 = vector.shape_cast %8 : vector<1x32x32xf32> to vector<32x32xf32>
    %c1 = arith.constant 1 : index
    %c0_18 = arith.constant 0 : index
    %c0_19 = arith.constant 0 : index
    %10 = vector.load %arg11[%c1, %c0_18, %c0_19] : memref<3x32x32xf32, #tpu.memory_space<vmem>>, vector<1x32x32xf32>
    %11 = vector.shape_cast %10 : vector<1x32x32xf32> to vector<32x32xf32>
    %c2 = arith.constant 2 : index
    %c0_20 = arith.constant 0 : index
    %c0_21 = arith.constant 0 : index
    %12 = vector.load %arg11[%c2, %c0_20, %c0_21] : memref<3x32x32xf32, #tpu.memory_space<vmem>>, vector<1x32x32xf32>
    %13 = vector.shape_cast %12 : vector<1x32x32xf32> to vector<32x32xf32>
    %c0_22 = arith.constant 0 : index
    %c0_23 = arith.constant 0 : index
    %14 = vector.load %arg12[%c0_22, %c0_23] : memref<32x1xf32, #tpu.memory_space<vmem>>, vector<32x1xf32>
    %c0_24 = arith.constant 0 : index
    %c0_25 = arith.constant 0 : index
    %c0_26 = arith.constant 0 : index
    %15 = vector.load %arg13[%c0_24, %c0_25, %c0_26] : memref<2x1x64xf32, #tpu.memory_space<vmem>>, vector<1x1x64xf32>
    %16 = vector.shape_cast %15 : vector<1x1x64xf32> to vector<1x64xf32>
    %c1_27 = arith.constant 1 : index
    %c0_28 = arith.constant 0 : index
    %c0_29 = arith.constant 0 : index
    %17 = vector.load %arg13[%c1_27, %c0_28, %c0_29] : memref<2x1x64xf32, #tpu.memory_space<vmem>>, vector<1x1x64xf32>
    %18 = vector.shape_cast %17 : vector<1x1x64xf32> to vector<1x64xf32>
    %c0_30 = arith.constant 0 : index
    %c0_31 = arith.constant 0 : index
    %c0_32 = arith.constant 0 : index
    %19 = vector.load %arg14[%c0_30, %c0_31, %c0_32] : memref<9x1x32xf32, #tpu.memory_space<vmem>>, vector<1x1x32xf32>
    %20 = vector.shape_cast %19 : vector<1x1x32xf32> to vector<1x32xf32>
    %c1_33 = arith.constant 1 : index
    %c0_34 = arith.constant 0 : index
    %c0_35 = arith.constant 0 : index
    %21 = vector.load %arg14[%c1_33, %c0_34, %c0_35] : memref<9x1x32xf32, #tpu.memory_space<vmem>>, vector<1x1x32xf32>
    %22 = vector.shape_cast %21 : vector<1x1x32xf32> to vector<1x32xf32>
    %c2_36 = arith.constant 2 : index
    %c0_37 = arith.constant 0 : index
    %c0_38 = arith.constant 0 : index
    %23 = vector.load %arg14[%c2_36, %c0_37, %c0_38] : memref<9x1x32xf32, #tpu.memory_space<vmem>>, vector<1x1x32xf32>
    %24 = vector.shape_cast %23 : vector<1x1x32xf32> to vector<1x32xf32>
    %c3 = arith.constant 3 : index
    %c0_39 = arith.constant 0 : index
    %c0_40 = arith.constant 0 : index
    %25 = vector.load %arg14[%c3, %c0_39, %c0_40] : memref<9x1x32xf32, #tpu.memory_space<vmem>>, vector<1x1x32xf32>
    %26 = vector.shape_cast %25 : vector<1x1x32xf32> to vector<1x32xf32>
    %c4 = arith.constant 4 : index
    %c0_41 = arith.constant 0 : index
    %c0_42 = arith.constant 0 : index
    %27 = vector.load %arg14[%c4, %c0_41, %c0_42] : memref<9x1x32xf32, #tpu.memory_space<vmem>>, vector<1x1x32xf32>
    %28 = vector.shape_cast %27 : vector<1x1x32xf32> to vector<1x32xf32>
    %c5 = arith.constant 5 : index
    %c0_43 = arith.constant 0 : index
    %c0_44 = arith.constant 0 : index
    %29 = vector.load %arg14[%c5, %c0_43, %c0_44] : memref<9x1x32xf32, #tpu.memory_space<vmem>>, vector<1x1x32xf32>
    %30 = vector.shape_cast %29 : vector<1x1x32xf32> to vector<1x32xf32>
    %c6 = arith.constant 6 : index
    %c0_45 = arith.constant 0 : index
    %c0_46 = arith.constant 0 : index
    %31 = vector.load %arg14[%c6, %c0_45, %c0_46] : memref<9x1x32xf32, #tpu.memory_space<vmem>>, vector<1x1x32xf32>
    %32 = vector.shape_cast %31 : vector<1x1x32xf32> to vector<1x32xf32>
    %c7 = arith.constant 7 : index
    %c0_47 = arith.constant 0 : index
    %c0_48 = arith.constant 0 : index
    %33 = vector.load %arg14[%c7, %c0_47, %c0_48] : memref<9x1x32xf32, #tpu.memory_space<vmem>>, vector<1x1x32xf32>
    %34 = vector.shape_cast %33 : vector<1x1x32xf32> to vector<1x32xf32>
    %c8 = arith.constant 8 : index
    %c0_49 = arith.constant 0 : index
    %c0_50 = arith.constant 0 : index
    %35 = vector.load %arg14[%c8, %c0_49, %c0_50] : memref<9x1x32xf32, #tpu.memory_space<vmem>>, vector<1x1x32xf32>
    %36 = vector.shape_cast %35 : vector<1x1x32xf32> to vector<1x32xf32>
    %cst = arith.constant dense<0.000000e+00> : vector<32xf32>
    %37 = vector.multi_reduction <add>, %0, %cst [0] : vector<16x32xf32> to vector<32xf32>
    %38 = vector.shape_cast %37 : vector<32xf32> to vector<1x32xf32>
    %39 = arith.mulf %0, %0 : vector<16x32xf32>
    %cst_51 = arith.constant dense<0.000000e+00> : vector<32xf32>
    %40 = vector.multi_reduction <add>, %39, %cst_51 [0] : vector<16x32xf32> to vector<32xf32>
    %41 = vector.shape_cast %40 : vector<32xf32> to vector<1x32xf32>
    %cst_52 = arith.constant 6.250000e-02 : f32
    %42 = vector.broadcast %cst_52 : f32 to vector<1x32xf32>
    %43 = arith.mulf %38, %42 : vector<1x32xf32>
    %cst_53 = arith.constant 6.250000e-02 : f32
    %44 = vector.broadcast %cst_53 : f32 to vector<1x32xf32>
    %45 = arith.mulf %41, %44 : vector<1x32xf32>
    %46 = arith.mulf %43, %43 : vector<1x32xf32>
    %47 = arith.subf %45, %46 : vector<1x32xf32>
    %48 = vector.broadcast %43 : vector<1x32xf32> to vector<16x32xf32>
    %49 = arith.subf %0, %48 : vector<16x32xf32>
    %cst_54 = arith.constant 9.99999974E-6 : f32
    %50 = vector.broadcast %cst_54 : f32 to vector<1x32xf32>
    %51 = arith.addf %47, %50 : vector<1x32xf32>
    %52 = math.rsqrt %51 : vector<1x32xf32>
    %53 = vector.broadcast %52 : vector<1x32xf32> to vector<16x32xf32>
    %54 = arith.mulf %49, %53 : vector<16x32xf32>
    %55 = vector.broadcast %20 : vector<1x32xf32> to vector<16x32xf32>
    %56 = arith.mulf %54, %55 : vector<16x32xf32>
    %57 = vector.broadcast %22 : vector<1x32xf32> to vector<16x32xf32>
    %58 = arith.addf %56, %57 : vector<16x32xf32>
    %cst_55 = arith.constant dense<0.000000e+00> : vector<16x64xf32>
    %59 = tpu.matmul %58, %6, %cst_55 {dimension_numbers = #tpu.dot_dimension_numbers<[1], [0], [0], [1], [0, 0, 1, 1], [], []>} : vector<16x32xf32>, vector<32x64xf32>, vector<16x64xf32> -> vector<16x64xf32>
    %60 = vector.broadcast %16 : vector<1x64xf32> to vector<16x64xf32>
    %61 = arith.addf %59, %60 : vector<16x64xf32>
    %c0_56 = arith.constant 0 : index
    %c0_57 = arith.constant 0 : index
    %62 = vector.load %arg1[%c0_56, %c0_57] : memref<16x16xf32, #tpu.memory_space<vmem>>, vector<16x16xf32>
    %63 = vector.extract_strided_slice %61 {offsets = [0, 0], sizes = [16, 32], strides = [1, 1]} : vector<16x64xf32> to vector<16x32xf32>
    %cst_58 = arith.constant dense<0.000000e+00> : vector<16x32xf32>
    %64 = tpu.matmul %62, %63, %cst_58 {dimension_numbers = #tpu.dot_dimension_numbers<[1], [0], [0], [1], [0, 0, 1, 1], [], []>} : vector<16x16xf32>, vector<16x32xf32>, vector<16x32xf32> -> vector<16x32xf32>
    %65 = vector.broadcast %4 : vector<16x1xf32> to vector<16x32xf32>
    %66 = arith.mulf %65, %64 : vector<16x32xf32>
    %c0_59 = arith.constant 0 : index
    %c0_60 = arith.constant 0 : index
    %67 = vector.load %arg0[%c0_59, %c0_60] : memref<16x16xf32, #tpu.memory_space<vmem>>, vector<16x16xf32>
    %68 = vector.extract_strided_slice %61 {offsets = [0, 32], sizes = [16, 32], strides = [1, 1]} : vector<16x64xf32> to vector<16x32xf32>
    %cst_61 = arith.constant dense<0.000000e+00> : vector<16x32xf32>
    %69 = tpu.matmul %67, %68, %cst_61 {dimension_numbers = #tpu.dot_dimension_numbers<[1], [0], [0], [1], [0, 0, 1, 1], [], []>} : vector<16x16xf32>, vector<16x32xf32>, vector<16x32xf32> -> vector<16x32xf32>
    %70 = vector.broadcast %5 : vector<16x1xf32> to vector<16x32xf32>
    %71 = arith.mulf %70, %69 : vector<16x32xf32>
    %72 = tpu.concatenate %66, %71, %58 in 1 : vector<16x32xf32>, vector<16x32xf32>, vector<16x32xf32> -> vector<16x96xf32>
    %cst_62 = arith.constant dense<0.000000e+00> : vector<16x64xf32>
    %73 = tpu.matmul %72, %7, %cst_62 {dimension_numbers = #tpu.dot_dimension_numbers<[1], [0], [0], [1], [0, 0, 1, 1], [], []>} : vector<16x96xf32>, vector<96x64xf32>, vector<16x64xf32> -> vector<16x64xf32>
    %74 = vector.broadcast %18 : vector<1x64xf32> to vector<16x64xf32>
    %75 = arith.addf %73, %74 : vector<16x64xf32>
    %76 = vector.extract_strided_slice %75 {offsets = [0, 0], sizes = [16, 32], strides = [1, 1]} : vector<16x64xf32> to vector<16x32xf32>
    %77 = arith.negf %76 : vector<16x32xf32>
    %78 = math.exp %77 : vector<16x32xf32>
    %cst_63 = arith.constant 1.000000e+00 : f32
    %79 = vector.broadcast %cst_63 : f32 to vector<16x32xf32>
    %80 = arith.addf %79, %78 : vector<16x32xf32>
    %81 = arith.divf %79, %80 : vector<16x32xf32>
    %82 = vector.extract_strided_slice %75 {offsets = [0, 32], sizes = [16, 32], strides = [1, 1]} : vector<16x64xf32> to vector<16x32xf32>
    %83 = math.tanh %82 : vector<16x32xf32>
    %84 = arith.subf %58, %83 : vector<16x32xf32>
    %85 = arith.mulf %81, %84 : vector<16x32xf32>
    %86 = arith.addf %83, %85 : vector<16x32xf32>
    %cst_64 = arith.constant 0.000000e+00 : f32
    %87 = vector.broadcast %cst_64 : f32 to vector<16x32xf32>
    %88 = arith.cmpf oge, %86, %87 : vector<16x32xf32>
    %89 = vector.broadcast %24 : vector<1x32xf32> to vector<16x32xf32>
    %90 = arith.mulf %86, %89 : vector<16x32xf32>
    %91 = arith.select %88, %86, %90 : vector<16x32xi1>, vector<16x32xf32>
    %cst_65 = arith.constant dense<0.000000e+00> : vector<2x32xf32>
    %92 = tpu.matmul %3, %91, %cst_65 {dimension_numbers = #tpu.dot_dimension_numbers<[1], [0], [0], [1], [0, 0, 1, 1], [], []>} : vector<2x16xf32>, vector<16x32xf32>, vector<2x32xf32> -> vector<2x32xf32>
    %cst_66 = arith.constant dense<0.000000e+00> : vector<32xf32>
    %93 = vector.multi_reduction <add>, %91, %cst_66 [0] : vector<16x32xf32> to vector<32xf32>
    %94 = vector.shape_cast %93 : vector<32xf32> to vector<1x32xf32>
    %95 = arith.mulf %91, %91 : vector<16x32xf32>
    %cst_67 = arith.constant dense<0.000000e+00> : vector<32xf32>
    %96 = vector.multi_reduction <add>, %95, %cst_67 [0] : vector<16x32xf32> to vector<32xf32>
    %97 = vector.shape_cast %96 : vector<32xf32> to vector<1x32xf32>
    %cst_68 = arith.constant 6.250000e-02 : f32
    %98 = vector.broadcast %cst_68 : f32 to vector<1x32xf32>
    %99 = arith.mulf %94, %98 : vector<1x32xf32>
    %cst_69 = arith.constant 6.250000e-02 : f32
    %100 = vector.broadcast %cst_69 : f32 to vector<1x32xf32>
    %101 = arith.mulf %97, %100 : vector<1x32xf32>
    %102 = arith.mulf %99, %99 : vector<1x32xf32>
    %103 = arith.subf %101, %102 : vector<1x32xf32>
    %104 = vector.broadcast %99 : vector<1x32xf32> to vector<16x32xf32>
    %105 = arith.subf %91, %104 : vector<16x32xf32>
    %cst_70 = arith.constant 9.99999974E-6 : f32
    %106 = vector.broadcast %cst_70 : f32 to vector<1x32xf32>
    %107 = arith.addf %103, %106 : vector<1x32xf32>
    %108 = math.rsqrt %107 : vector<1x32xf32>
    %109 = vector.broadcast %108 : vector<1x32xf32> to vector<16x32xf32>
    %110 = arith.mulf %105, %109 : vector<16x32xf32>
    %111 = vector.broadcast %26 : vector<1x32xf32> to vector<16x32xf32>
    %112 = arith.mulf %110, %111 : vector<16x32xf32>
    %113 = vector.broadcast %28 : vector<1x32xf32> to vector<16x32xf32>
    %114 = arith.addf %112, %113 : vector<16x32xf32>
    %cst_71 = arith.constant dense<0.000000e+00> : vector<32xf32>
    %115 = vector.multi_reduction <add>, %1, %cst_71 [0] : vector<2x32xf32> to vector<32xf32>
    %116 = vector.shape_cast %115 : vector<32xf32> to vector<1x32xf32>
    %117 = arith.mulf %1, %1 : vector<2x32xf32>
    %cst_72 = arith.constant dense<0.000000e+00> : vector<32xf32>
    %118 = vector.multi_reduction <add>, %117, %cst_72 [0] : vector<2x32xf32> to vector<32xf32>
    %119 = vector.shape_cast %118 : vector<32xf32> to vector<1x32xf32>
    %cst_73 = arith.constant 5.000000e-01 : f32
    %120 = vector.broadcast %cst_73 : f32 to vector<1x32xf32>
    %121 = arith.mulf %116, %120 : vector<1x32xf32>
    %cst_74 = arith.constant 5.000000e-01 : f32
    %122 = vector.broadcast %cst_74 : f32 to vector<1x32xf32>
    %123 = arith.mulf %119, %122 : vector<1x32xf32>
    %124 = arith.mulf %121, %121 : vector<1x32xf32>
    %125 = arith.subf %123, %124 : vector<1x32xf32>
    %126 = vector.broadcast %121 : vector<1x32xf32> to vector<2x32xf32>
    %127 = arith.subf %1, %126 : vector<2x32xf32>
    %cst_75 = arith.constant 9.99999974E-6 : f32
    %128 = vector.broadcast %cst_75 : f32 to vector<1x32xf32>
    %129 = arith.addf %125, %128 : vector<1x32xf32>
    %130 = math.rsqrt %129 : vector<1x32xf32>
    %131 = vector.broadcast %130 : vector<1x32xf32> to vector<2x32xf32>
    %132 = arith.mulf %127, %131 : vector<2x32xf32>
    %133 = vector.broadcast %30 : vector<1x32xf32> to vector<2x32xf32>
    %134 = arith.mulf %132, %133 : vector<2x32xf32>
    %135 = vector.broadcast %32 : vector<1x32xf32> to vector<2x32xf32>
    %136 = arith.addf %134, %135 : vector<2x32xf32>
    %cst_76 = arith.constant dense<0.000000e+00> : vector<16x32xf32>
    %137 = tpu.matmul %114, %11, %cst_76 {dimension_numbers = #tpu.dot_dimension_numbers<[1], [0], [0], [1], [0, 0, 1, 1], [], []>} : vector<16x32xf32>, vector<32x32xf32>, vector<16x32xf32> -> vector<16x32xf32>
    %cst_77 = arith.constant dense<0.000000e+00> : vector<2x32xf32>
    %138 = tpu.matmul %3, %114, %cst_77 {dimension_numbers = #tpu.dot_dimension_numbers<[1], [0], [0], [1], [0, 0, 1, 1], [], []>} : vector<2x16xf32>, vector<16x32xf32>, vector<2x32xf32> -> vector<2x32xf32>
    %cst_78 = arith.constant dense<0.000000e+00> : vector<2x32xf32>
    %139 = tpu.matmul %136, %9, %cst_78 {dimension_numbers = #tpu.dot_dimension_numbers<[1], [0], [0], [1], [0, 0, 1, 1], [], []>} : vector<2x32xf32>, vector<32x32xf32>, vector<2x32xf32> -> vector<2x32xf32>
    %140 = vector.broadcast %34 : vector<1x32xf32> to vector<2x32xf32>
    %141 = arith.addf %139, %140 : vector<2x32xf32>
    %cst_79 = arith.constant dense<0.000000e+00> : vector<2x32xf32>
    %142 = tpu.matmul %138, %13, %cst_79 {dimension_numbers = #tpu.dot_dimension_numbers<[1], [0], [0], [1], [0, 0, 1, 1], [], []>} : vector<2x32xf32>, vector<32x32xf32>, vector<2x32xf32> -> vector<2x32xf32>
    %143 = arith.addf %141, %142 : vector<2x32xf32>
    %cst_80 = arith.constant dense<0.000000e+00> : vector<16x32xf32>
    %144 = tpu.matmul %2, %143, %cst_80 {dimension_numbers = #tpu.dot_dimension_numbers<[0], [0], [1], [1], [0, 1, 1, 1], [], []>} : vector<2x16xf32>, vector<2x32xf32>, vector<16x32xf32> -> vector<16x32xf32>
    %145 = arith.addf %144, %137 : vector<16x32xf32>
    %146 = arith.negf %145 : vector<16x32xf32>
    %147 = math.exp %146 : vector<16x32xf32>
    %cst_81 = arith.constant 1.000000e+00 : f32
    %148 = vector.broadcast %cst_81 : f32 to vector<16x32xf32>
    %149 = arith.addf %148, %147 : vector<16x32xf32>
    %150 = arith.divf %148, %149 : vector<16x32xf32>
    %cst_82 = arith.constant dense<0.000000e+00> : vector<16x1xf32>
    %151 = tpu.matmul %150, %14, %cst_82 {dimension_numbers = #tpu.dot_dimension_numbers<[1], [0], [0], [1], [0, 0, 1, 1], [], []>} : vector<16x32xf32>, vector<32x1xf32>, vector<16x1xf32> -> vector<16x1xf32>
    %152 = tpu.transpose %151, [1, 0] : vector<16x1xf32> -> vector<1x16xf32>
    %c0_83 = arith.constant 0 : index
    %c0_84 = arith.constant 0 : index
    %153 = vector.load %arg8[%c0_83, %c0_84] : memref<1x16xf32, #tpu.memory_space<vmem>>, vector<1x16xf32>
    %154 = arith.addf %152, %153 : vector<1x16xf32>
    %cst_85 = arith.constant 0.000000e+00 : f32
    %155 = vector.broadcast %cst_85 : f32 to vector<2x16xf32>
    %156 = arith.cmpf ogt, %2, %155 : vector<2x16xf32>
    %cst_86 = arith.constant -1.000000e+30 : f32
    %157 = vector.shape_cast %154 : vector<1x16xf32> to vector<1x16xf32>
    %158 = vector.broadcast %157 : vector<1x16xf32> to vector<2x16xf32>
    %159 = vector.broadcast %cst_86 : f32 to vector<2x16xf32>
    %160 = arith.select %156, %158, %159 : vector<2x16xi1>, vector<2x16xf32>
    %cst_87 = arith.constant dense<0xFF800000> : vector<2xf32>
    %161 = vector.multi_reduction <maximumf>, %160, %cst_87 [1] : vector<2x16xf32> to vector<2xf32>
    %162 = vector.shape_cast %161 : vector<2xf32> to vector<2x1xf32>
    %163 = vector.broadcast %162 : vector<2x1xf32> to vector<2x16xf32>
    %164 = arith.subf %160, %163 : vector<2x16xf32>
    %165 = math.exp %164 : vector<2x16xf32>
    %cst_88 = arith.constant dense<0.000000e+00> : vector<2xf32>
    %166 = vector.multi_reduction <add>, %165, %cst_88 [1] : vector<2x16xf32> to vector<2xf32>
    %167 = vector.shape_cast %166 : vector<2xf32> to vector<2x1xf32>
    %cst_89 = arith.constant 1.000000e+00 : f32
    %168 = vector.broadcast %cst_89 : f32 to vector<2x1xf32>
    %169 = arith.divf %168, %167 : vector<2x1xf32>
    %170 = vector.broadcast %169 : vector<2x1xf32> to vector<2x16xf32>
    %171 = arith.mulf %165, %170 : vector<2x16xf32>
    %cst_90 = arith.constant dense<0.000000e+00> : vector<2x32xf32>
    %172 = tpu.matmul %171, %114, %cst_90 {dimension_numbers = #tpu.dot_dimension_numbers<[1], [0], [0], [1], [0, 0, 1, 1], [], []>} : vector<2x16xf32>, vector<16x32xf32>, vector<2x32xf32> -> vector<2x32xf32>
    %cst_91 = arith.constant 0.000000e+00 : f32
    %173 = vector.broadcast %cst_91 : f32 to vector<2x32xf32>
    %174 = arith.cmpf oge, %172, %173 : vector<2x32xf32>
    %175 = vector.broadcast %36 : vector<1x32xf32> to vector<2x32xf32>
    %176 = arith.mulf %172, %175 : vector<2x32xf32>
    %177 = arith.select %174, %172, %176 : vector<2x32xi1>, vector<2x32xf32>
    %c0_92 = arith.constant 0 : index
    %c0_93 = arith.constant 0 : index
    %178 = vector.load %arg15[%c0_92, %c0_93] : memref<2x64xf32, #tpu.memory_space<vmem>>, vector<2x32xf32>
    tpu.vector_store %arg15[%c0_92, %c0_93], %92 {strides = array<i32>} : memref<2x64xf32, #tpu.memory_space<vmem>>, vector<2x32xf32>,
    %c0_94 = arith.constant 0 : index
    %c32 = arith.constant 32 : index
    %179 = vector.load %arg15[%c0_94, %c32] : memref<2x64xf32, #tpu.memory_space<vmem>>, vector<2x32xf32>
    tpu.vector_store %arg15[%c0_94, %c32], %177 {strides = array<i32>} : memref<2x64xf32, #tpu.memory_space<vmem>>, vector<2x32xf32>,
    return
  }
}

</mosaic_0001>

<bundles_post_ra>
// kernel: serec_layer.1
= control target key start
LH: loop header
LB: loop body
LE: loop exit
PB: predicated region body
PF: predicated region fallthrough
CT: control target
= control target key end

     0   :  { %vm114_vm0 = vcmask 261120   ;;  %s2097_s0 = inlined_call_operand.vmem [shape: f32[16,16], index: 0, kind: input, shape index: {}]   ;;  %s2098_s1 = inlined_call_operand.vmem [shape: f32[16,16], index: 1, kind: input, shape index: {}]   ;;  %s2099_s2 = inlined_call_operand.vmem [shape: f32[16,32], index: 2, kind: input, shape index: {}]   ;;  %s2100_s3 = inlined_call_operand.vmem [shape: f32[2,32], index: 3, kind: input, shape index: {}]   ;;  %s2101_s4 = inlined_call_operand.vmem [shape: f32[2,16], index: 4, kind: input, shape index: {}]   ;;  %s2102_s5 = inlined_call_operand.vmem [shape: f32[2,16], index: 5, kind: input, shape index: {}]   ;;  %s2103_s6 = inlined_call_operand.vmem [shape: f32[16,1], index: 6, kind: input, shape index: {}]   ;;  %s2104_s7 = inlined_call_operand.vmem [shape: f32[16,1], index: 7, kind: input, shape index: {}]   ;;  %s2105_s8 = inlined_call_operand.vmem [shape: f32[1,16], index: 8, kind: input, shape index: {}]   ;;  %s2106_s9 = inlined_call_operand.vmem [shape: f32[32,64], index: 9, kind: input, shape index: {}]   ;;  %s2107_s10 = inlined_call_operand.vmem [shape: f32[96,64], index: 10, kind: input, shape index: {}]   ;;  %s2108_s11 = inlined_call_operand.vmem [shape: f32[3,32,32], index: 11, kind: input, shape index: {}]   ;;  %s2109_s12 = inlined_call_operand.vmem [shape: f32[32,1], index: 12, kind: input, shape index: {}]   ;;  %s2110_s13 = inlined_call_operand.vmem [shape: f32[2,1,64], index: 13, kind: input, shape index: {}]   ;;  %s2111_s14 = inlined_call_operand.vmem [shape: f32[9,1,32], index: 14, kind: input, shape index: {}]   ;;  %s2112_s15 = inlined_call_operand.hbm [shape: f32[2,64], index: 15, kind: output, shape index: {}]  }
   0x1   :  { %v63_v0 = vld [vmem:[%s2106_s9 + $0x18] sm:$0xff]  ;;  %v62_v1 = vld [vmem:[%s2106_s9 + $0x10] sm:$0xff]  ;;  %v51_v2 = vld [vmem:[%s2099_s2] sm:$0xff] }
   0x2   :  { %1565 = vmatprep.subr.mxu0 %v63_v0  ;;  %v52_v3 = vld [vmem:[%s2099_s2 + $0x8] sm:$0xff]  ;;  %v115_v5 = vsel %vm114_vm0, %v51_v2, 0.0  ;;  %v124_v7 = vmul.f32 %v51_v2, %v51_v2 }
   0x3   :  { %1566 = vmatpush3.msra.mxu0 %v63_v0  ;;  %v61_v4 = vld [vmem:[%s2106_s9 + $0x8] sm:$0xff]  ;;  %v116_v6 = vsel %vm114_vm0, %v52_v3, 0.0  ;;  %v125_v8 = vmul.f32 %v52_v3, %v52_v3 }
   0x4   :  { %1567 = vmatprep.subr.mxu0 %v62_v1  ;;  %v117_v9 = vadd.f32 %v116_v6, %v115_v5 }
   0x5   :  { %20 = vsyncpa [#allocation3], 0  ;;  %1568 = vmatpush3.msra.mxu0 %v62_v1  ;;  %v60_v10 = vld [vmem:[%s2106_s9] sm:$0xff]  ;;  %v126_v11 = vsel %vm114_vm0, %v124_v7, 0.0  ;;  %v127_v12 = vsel %vm114_vm0, %v125_v8, 0.0  ;;  %vm250_vm1 = vcmask 130048  }
   0x6   :  { %1569 = vmatprep.subr.mxu0 %v61_v4  ;;  %v118_v13 = vrot.slane %v117_v9, 4  ;;  %v128_v14 = vadd.f32 %v127_v12, %v126_v11  ;;  %v1468_v34 = vld [vmem:[%s2111_s14] ss:$0 sm:$0xff]  ;;  %v1469_v37 = vld [vmem:[%s2111_s14 + $0x1] ss:$0 sm:$0xff]  ;;  %v1748_v44 = vmov 0  }
   0x7   :  { %1570 = vmatpush3.msra.mxu0 %v61_v4  ;;  %v248_v42 = vld [vmem:[%s2098_s1] sm:$0xff]  ;;  %1694 = vset.pattern.permute.xlu1 %v1748_v44  ;;  %v59_v46 = vld [vmem:[%s2104_s7 + $0x8] sm:$0xff]  ;;  %s1749_s25 = smov 96   ;;  %v75_v58 = vld [vmem:[%s2107_s10 + $0x58] sm:$0xff]  ;;  %s1751_s21 = smov 64   ;;  %vm463_vm2 = vcmask 523264  }
   0x8   :  { %1571 = vmatprep.subr.mxu0 %v60_v10  ;;  %v119_v15 = vadd.f32 %v118_v13, %v117_v9  ;;  %v129_v16 = vrot.slane %v128_v14, 4  ;;  %1580 = vmatprep.mubr.msk.f32.mxu1 %vm250_vm1, %v248_v42  ;;  %v58_v43 = vld [vmem:[%s2104_s7] sm:$0xff]  ;;  %v57_v51 = vld [vmem:[%s2103_s6 + $0x8] sm:$0xff]  ;;  %v74_v59 = vld [vmem:[%s2107_s10 + $0x50] sm:$0xff]  ;;  %vm472_vm3 = vcmask 785408   ;;  %vm1753_vm4 = vmmov 0  }
   0x9   :  { %1572 = vmatpush3.msra.mxu0 %v60_v10  ;;  %1695 = vset.pattern.permute.xlu0 %v1748_v44  ;;  %v1470_v45 = vld [vmem:[%s2110_s13] ss:$0 sm:$0xff]  ;;  %v249_v52 = vld [vmem:[%s2098_s1 + $0x8] sm:$0xff]  ;;  %v71_v62 = vld [vmem:[%s2107_s10 + $0x38] sm:$0xff]  ;;  %vm685_vm5 = vcmask 523520   ;;  %vm736_vm8 = vcmask 254976  }
   0xa   :  { %v120_v17 = vrot.slane %v119_v15, 2  ;;  %v130_v18 = vadd.f32 %v129_v16, %v128_v14  ;;  %437 = vperm.xlu1 %1694, %v58_v43   ;;  %v344_v53 = vld [vmem:[%s2097_s0] sm:$0xff]  ;;  %v345_v57 = vld [vmem:[%s2097_s0 + $0x8] sm:$0xff]  ;;  %1590 = vmatprep.subr.mxu0 %v75_v58  ;;  %v70_v63 = vld [vmem:[%s2107_s10 + $0x30] sm:$0xff]  ;;  %vm1116_vm9 = vcmask 15360   ;;  %vm1123_vm10 = vcmask 1041408  }
   0xb   :  { %v56_v54 = vld [vmem:[%s2103_s6] sm:$0xff]  ;;  %v73_v60 = vld [vmem:[%s2107_s10 + $0x48] sm:$0xff]  ;;  %s1750_s6 = smov 32   ;;  %vm1335_vm12 = vcmask 123904   ;;  %s1754_s23 = smov [#allocation2]   ;;  %vm1435_vm14 = vcmask 517376  }
   0xc   :  { %v121_v19 = vadd.f32 %v120_v17, %v119_v15  ;;  %v131_v20 = vrot.slane %v130_v18, 2  ;;  %v72_v61 = vld [vmem:[%s2107_s10 + $0x40] sm:$0xff]  ;;  %v69_v0 = vld [vmem:[%s2107_s10 + $0x28] sm:$0xff]  ;;  %s1443_s24 = sshll.u32 %s1754_s23, 4  ;;  %s1444_s24 = int_to_ptr.vmem [resolvable:$true] %s1443_s24 }
   0xd   :  { %v68_v1 = vld [vmem:[%s2107_s10 + $0x20] sm:$0xff]  ;;  %v65_v4 = vld [vmem:[%s2107_s10 + $0x8] sm:$0xff]  ;;  %s1726_s26 = scalar_lea.vmem %s1444_s24, 32  ;;  %p1731_p1 = scmp.lt.s32.totalorder %s1444_s24, %s1444_s24 }
   0xe   :  { %v122_v21 = vrot.slane %v121_v19, 1  ;;  %v132_v22 = vadd.f32 %v131_v20, %v130_v18  ;;  %442 = vperm.xlu1 %1694, %v59_v46   ;;  %v64_v7 = vld [vmem:[%s2107_s10] sm:$0xff]  ;;  %p1727_p0 = scmp.ne.s32.totalorder %s1444_s24, %s1726_s26  ;;  %p1732_p2 = scmp.lt.s32.totalorder %s1726_s26, %s1726_s26 }
  0x10   :  { %v123_v23 = vadd.f32 %v122_v21, %v121_v19  ;;  %v133_v24 = vrot.slane %v132_v22, 1  ;;  %p1733_p3 = por %p1732_p2, %p1731_p1 }
  0x12   :  { %v134_v25 = vadd.f32 %v133_v24, %v132_v22  ;;  %v135_v26 = vmul.f32 0.0625, %v123_v23  ;;  %339 = vperm.xlu1 %1694, %v57_v51   ;;  %p1734_p4 = pnand %p1733_p3, %p1727_p0 }
  0x14   :  { %v136_v27 = vmul.f32 0.0625, %v134_v25  ;;  %v137_v28 = vmul.f32 %v135_v26, %v135_v26  ;;  %v139_v31 = vsub.f32 %v51_v2, %v135_v26  ;;  %v140_v32 = vsub.f32 %v52_v3, %v135_v26  ;;  %v67_v2 = vld [vmem:[%s2107_s10 + $0x18] sm:$0xff]  ;;  %v66_v3 = vld [vmem:[%s2107_s10 + $0x10] sm:$0xff]  ;;  %v1477_v26 = vld [vmem:[%s2110_s13 + $0x1] ss:$0 sm:$0xff] }
  0x16   :  { %v138_v29 = vsub.f32 %v136_v27, %v137_v28 }
  0x18   :  { %v141_v30 = vadd.f32 1e-05, %v138_v29 }
  0x1a   :  { %1696 = vrsqrt.f32 %v141_v30 }
  0x27   :  { %v1697_v33 = vpop.eup %1696 }
  0x28   :  { %v143_v35 = vmul.f32 %v1697_v33, %v139_v31  ;;  %v144_v36 = vmul.f32 %v1697_v33, %v140_v32 }
  0x2a   :  { %v151_v38 = vmul.f32 %v1468_v34, %v143_v35  ;;  %v152_v39 = vmul.f32 %v1468_v34, %v144_v36 }
  0x2c   :  { %v1863_v40 = vadd.f32 %v1469_v37, %v151_v38  ;;  %v1865_v41 = vadd.f32 %v1469_v37, %v152_v39 }
  0x2e   :  { %1573 = vmatprep.mubr.msk.f32.mxu0 %vm114_vm0, %v1863_v40 }
  0x2f   :  { %1574 = vmatmul.mubr.msk.f32.vlgmr.msra.gmra.mxu0 %vm114_vm0, %v1865_v41 }
  0x30   :  { %1591 = vmatpush3.msra.mxu0 %v75_v58 }
  0x31   :  { %1592 = vmatprep.subr.mxu0 %v74_v59 }
  0x32   :  { %1593 = vmatpush3.msra.mxu0 %v74_v59 }
  0x33   :  { %1594 = vmatprep.subr.mxu0 %v73_v60 }
  0x34   :  { %1595 = vmatpush3.msra.mxu0 %v73_v60 }
  0x35   :  { %1596 = vmatprep.subr.mxu0 %v72_v61 }
  0x36   :  { %1597 = vmatpush3.msra.mxu0 %v72_v61 }
  0x37   :  { %1598 = vmatprep.subr.mxu0 %v71_v62 }
  0x38   :  { %1599 = vmatpush3.msra.mxu0 %v71_v62 }
  0x39   :  { %1600 = vmatprep.subr.mxu0 %v70_v63 }
  0x3a   :  { %1601 = vmatpush3.msra.mxu0 %v70_v63 }
  0x3b   :  { %1602 = vmatprep.subr.mxu0 %v69_v0 }
  0x3c   :  { %1603 = vmatpush3.msra.mxu0 %v69_v0 }
  0x3d   :  { %1604 = vmatprep.subr.mxu0 %v68_v1 }
  0x3e   :  { %1605 = vmatpush3.msra.mxu0 %v68_v1 }
  0x3f   :  { %1606 = vmatprep.subr.mxu0 %v67_v2 }
  0x40   :  { %1607 = vmatpush3.msra.mxu0 %v67_v2 }
  0x41   :  { %1608 = vmatprep.subr.mxu0 %v66_v3 }
  0x42   :  { %1609 = vmatpush3.msra.mxu0 %v66_v3 }
  0x43   :  { %1610 = vmatprep.subr.mxu0 %v65_v4 }
  0x44   :  { %1611 = vmatpush3.msra.mxu0 %v65_v4 }
  0x45   :  { %1612 = vmatprep.subr.mxu0 %v64_v7 }
  0x46   :  { %1613 = vmatpush3.msra.mxu0 %v64_v7 }
  0x85   :  { %v438_v5 = vpop.permute.xlu1 %437 }
  0x89   :  { %v443_v9 = vpop.permute.xlu1 %442 }
  0x8d   :  { %v340_v15 = vpop.permute.xlu1 %339 }
  0xef   :  { %v1575_v47 = vpop.f32.mrf.mxu0 }
  0xf0   :  { %v245_v48 = vadd.f32 %v1575_v47, %v1470_v45 }
  0xf1   :  { %v239_v49 = vpop.f32.mrf.mxu0 }
  0xf2   :  { %v240_v50 = vadd.f32 %v1470_v45, %v239_v49  ;;  %350 = vrot.lane.b32.xlu0 %v245_v48, %s1749_s25  ;;  %1576 = vmatprep.subr.mxu1 %v245_v48  ;;  %v1484_v49 = vld [vmem:[%s2111_s14 + $0x3] ss:$0 sm:$0xff] }
  0xf3   :  { %1577 = vmatpush3.msra.mxu1 %v245_v48 }
  0xf4   :  { %1578 = vmatprep.subr.mxu1 %v240_v50 }
  0xf5   :  { %1579 = vmatpush3.msra.mxu1 %v240_v50 }
  0xf6   :  { %348 = vrot.lane.b32.xlu0 %v240_v50, %s1749_s25  ;;  %1581 = vmatmul.mubr.msk.f32.vlgmr.msra.gmra.mxu1 %vm250_vm1, %v249_v52  ;;  %v1482_v50 = vld [vmem:[%s2111_s14 + $0x2] ss:$0 sm:$0xff] }
  0xf7   :  { %1587 = vmatprep.mubr.msk.f32.mxu1 %vm250_vm1, %v344_v53 }
  0xfa   :  { %334 = vperm.xlu0 %1695, %v56_v54  }
 0x164   :  { %v351_v55 = vpop.permute.xlu0 %350 }
 0x165   :  { %1583 = vmatprep.subr.mxu1 %v351_v55 }
 0x166   :  { %1584 = vmatpush3.msra.mxu1 %v351_v55 }
 0x168   :  { %v349_v56 = vpop.permute.xlu0 %348 }
 0x169   :  { %1585 = vmatprep.subr.mxu1 %v349_v56 }
 0x16a   :  { %1586 = vmatpush3.msra.mxu1 %v349_v56 }
 0x16b   :  { %1588 = vmatmul.mubr.msk.f32.vlgmr.msra.gmra.mxu1 %vm250_vm1, %v345_v57 }
 0x175   :  { %v335_v14 = vpop.permute.xlu0 %334 }
 0x1b6   :  { %v1582_v6 = vpop.f32.mrf.mxu1 }
 0x1b7   :  { %v343_v19 = vmul.f32 %v1582_v6, %v340_v15 }
 0x1b8   :  { %v323_v8 = vpop.f32.mrf.mxu1 }
 0x1b9   :  { %v342_v18 = vmul.f32 %v335_v14, %v323_v8 }
 0x22b   :  { %v1589_v10 = vpop.f32.mrf.mxu1 }
 0x22c   :  { %v446_v11 = vmul.f32 %v1589_v10, %v443_v9 }
 0x22d   :  { %v426_v12 = vpop.f32.mrf.mxu1 }
 0x22e   :  { %v445_v13 = vmul.f32 %v438_v5, %v426_v12  ;;  %451 = vrot.lane.b32.xlu0 %v446_v11, %s1750_s6 }
 0x230   :  { %449 = vrot.lane.b32.xlu1 %v445_v13, %s1750_s6 }
 0x232   :  { %457 = vrot.lane.b32.xlu0 %v1865_v41, %s1751_s21 }
 0x234   :  { %455 = vrot.lane.b32.xlu1 %v1863_v40, %s1751_s21 }
 0x2a0   :  { %v452_v16 = vpop.permute.xlu0 %451 }
 0x2a1   :  { %v462_v23 = vsel %vm114_vm0, %v343_v19, %v452_v16 }
 0x2a2   :  { %v450_v17 = vpop.permute.xlu1 %449 }
 0x2a3   :  { %v461_v21 = vsel %vm114_vm0, %v342_v18, %v450_v17 }
 0x2a4   :  { %v458_v20 = vpop.permute.xlu0 %457 }
 0x2a5   :  { %v465_v25 = vsel %vm463_vm2, %v462_v23, %v458_v20 }
 0x2a6   :  { %v456_v22 = vpop.permute.xlu1 %455 }
 0x2a7   :  { %v464_v24 = vsel %vm463_vm2, %v461_v21, %v456_v22 }
 0x2a8   :  { %1614 = vmatprep.mubr.msk.f32.mxu0 %vm472_vm3, %v464_v24 }
 0x2a9   :  { %1615 = vmatmul.mubr.msk.f32.vlgmr.msra.gmra.mxu0 %vm472_vm3, %v465_v25 }
 0x369   :  { %v1616_v27 = vpop.f32.mrf.mxu0 }
 0x36a   :  { %v551_v28 = vadd.f32 %v1616_v27, %v1477_v26 }
 0x36b   :  { %v545_v29 = vpop.f32.mrf.mxu0 }
 0x36c   :  { %1698 = vtanh.f32 %v551_v28  ;;  %v546_v30 = vadd.f32 %v1477_v26, %v545_v29  ;;  %v1481_v33 = vmul.f32 -1.442695, %v551_v28 }
 0x36e   :  { %1700 = vtanh.f32 %v546_v30  ;;  %v1480_v34 = vmul.f32 -1.442695, %v546_v30 }
 0x36f   :  { %1702 = vpow2.f32 %v1481_v33  ;;  %v55_v33 = vld [vmem:[%s2102_s5] sm:$0x3] }
 0x370   :  { %1704 = vpow2.f32 %v1480_v34  ;;  %v1454_v34 = vld [vmem:[%s2108_s11 + $0x38] sm:$0xff] }
 0x379   :  { %v1699_v31 = vpop.eup %1698 }
 0x37a   :  { %572 = vrot.lane.b32.xlu0 %v1699_v31, %s1749_s25 }
 0x37b   :  { %v1701_v32 = vpop.eup %1700 }
 0x37c   :  { %570 = vrot.lane.b32.xlu1 %v1701_v32, %s1749_s25  ;;  %v1703_v35 = vpop.eup %1702 }
 0x37d   :  { %v1705_v36 = vpop.eup %1704  ;;  %v561_v37 = vadd.f32 1.0, %v1703_v35 }
 0x37e   :  { %v560_v38 = vadd.f32 1.0, %v1705_v36  ;;  %v1453_v36 = vld [vmem:[%s2108_s11 + $0x30] sm:$0xff] }
 0x37f   :  { %1706 = vrcp.f32 %v561_v37  ;;  %v1452_v37 = vld [vmem:[%s2108_s11 + $0x28] sm:$0xff] }
 0x380   :  { %1708 = vrcp.f32 %v560_v38  ;;  %v1451_v38 = vld [vmem:[%s2108_s11 + $0x20] sm:$0xff] }
 0x38c   :  { %v1707_v43 = vpop.eup %1706 }
 0x38d   :  { %v1709_v47 = vpop.eup %1708 }
 0x3ec   :  { %v573_v39 = vpop.permute.xlu0 %572 }
 0x3ed   :  { %v577_v42 = vsub.f32 %v1865_v41, %v573_v39  ;;  %v1752_v41 = vmov 0.0  }
 0x3ee   :  { %v571_v45 = vpop.permute.xlu1 %570  ;;  %1617 = vmatprep.subr.mxu1 %v1752_v41  ;;  %1653 = vmatprep.subr.mxu0 %v1752_v41 }
 0x3ef   :  { %v579_v44 = vmul.f32 %v1707_v43, %v577_v42  ;;  %v576_v46 = vsub.f32 %v1863_v40, %v571_v45  ;;  %v1485_v40 = vld [vmem:[%s2111_s14 + $0x4] ss:$0 sm:$0xff]  ;;  %1621 = vmatprep.mubr.msk.f32.mxu1 %vm1753_vm4, %v1752_v41  ;;  %1661 = vmatprep.mubr.msk.f32.mxu0 %vm1753_vm4, %v1752_v41  ;;  %v53_v43 = vld [vmem:[%s2100_s3] sm:$0x3] }
 0x3f0   :  { %v737_v45 = vsel %vm736_vm8, %v53_v43, 0.0 }
 0x3f1   :  { %584 = vrot.lane.b32.xlu0 %v579_v44, %s1750_s6  ;;  %v578_v48 = vmul.f32 %v1709_v47, %v576_v46  ;;  %v744_v44 = vmul.f32 %v53_v43, %v53_v43  ;;  %v738_v46 = vrot.slane %v737_v45, 4 }
 0x3f3   :  { %582 = vrot.lane.b32.xlu1 %v578_v48, %s1750_s6  ;;  %v745_v47 = vsel %vm736_vm8, %v744_v44, 0.0  ;;  %v79_v48 = vld [vmem:[%s2108_s11 + $0x18] sm:$0xff] }
 0x3f5   :  { %721 = vrot.lane.b32.xlu0 %v1484_v49, %s1750_s6  ;;  %v78_v49 = vld [vmem:[%s2108_s11 + $0x10] sm:$0xff] }
 0x3f7   :  { %597 = vrot.lane.b32.xlu1 %v1482_v50, %s1750_s6  ;;  %v1458_v50 = vld [vmem:[%s2108_s11 + $0x58] sm:$0xff] }
 0x3f8   :  { %1654 = vmatpush3.msra.mxu0 %v1458_v50 }
 0x3f9   :  { %1655 = vmatprep.subr.mxu0 %v1752_v41 }
 0x3fb   :  { %731 = vrot.lane.b32.xlu1 %v1485_v40, %s1750_s6  ;;  %v746_v40 = vrot.slane %v745_v47, 4 }
 0x463   :  { %v585_v51 = vpop.permute.xlu0 %584 }
 0x464   :  { %v589_v53 = vadd.f32 %v1699_v31, %v585_v51  ;;  %v1457_v51 = vld [vmem:[%s2108_s11 + $0x50] sm:$0xff] }
 0x465   :  { %v583_v52 = vpop.permute.xlu1 %582  ;;  %1656 = vmatpush3.msra.mxu0 %v1457_v51 }
 0x466   :  { %v588_v54 = vadd.f32 %v1701_v32, %v583_v52  ;;  %vm591_vm6 = vcmp.ge.f32.partialorder %v589_v53, 0.0  ;;  %v739_v52 = vadd.f32 %v738_v46, %v737_v45  ;;  %1657 = vmatprep.subr.mxu0 %v1752_v41 }
 0x467   :  { %v722_v24 = vpop.permute.xlu0 %721 }
 0x468   :  { %vm590_vm7 = vcmp.ge.f32.partialorder %v588_v54, 0.0 }
 0x469   :  { %v598_v55 = vpop.permute.xlu1 %597 }
 0x46a   :  { %v600_v56 = vmul.f32 %v598_v55, %v588_v54  ;;  %v601_v57 = vmul.f32 %v598_v55, %v589_v53  ;;  %v740_v55 = vrot.slane %v739_v52, 2 }
 0x46c   :  { %v603_v58 = vsel %vm591_vm6, %v589_v53, %v601_v57  ;;  %v602_v59 = vsel %vm590_vm7, %v588_v54, %v600_v56  ;;  %v77_v53 = vld [vmem:[%s2108_s11 + $0x8] sm:$0xff]  ;;  %v747_v54 = vadd.f32 %v746_v40, %v745_v47  ;;  %v741_v57 = vadd.f32 %v740_v55, %v739_v52  ;;  %v1327_v40 = vld [vmem:[%s2105_s8] sm:$0x1] }
 0x46d   :  { %608 = vrot.lane.b32.xlu0 %v603_v58, %s1749_s25  ;;  %v687_v60 = vsel %vm685_vm5, %v603_v58, 0.0  ;;  %v696_v61 = vmul.f32 %v603_v58, %v603_v58  ;;  %606 = vrot.lane.b32.xlu1 %v602_v59, %s1749_s25  ;;  %v686_v62 = vsel %vm685_vm5, %v602_v59, 0.0  ;;  %v695_v63 = vmul.f32 %v602_v59, %v602_v59  ;;  %v732_v27 = vpop.permute.xlu1 %731 }
 0x46e   :  { %v688_v0 = vadd.f32 %v687_v60, %v686_v62  ;;  %v748_v56 = vrot.slane %v747_v54, 2 }
 0x46f   :  { %v698_v1 = vsel %vm685_vm5, %v696_v61, 0.0  ;;  %v697_v2 = vsel %vm685_vm5, %v695_v63, 0.0 }
 0x470   :  { %v689_v3 = vrot.slane %v688_v0, 4  ;;  %v699_v4 = vadd.f32 %v698_v1, %v697_v2 }
 0x472   :  { %v690_v5 = vadd.f32 %v689_v3, %v688_v0  ;;  %v700_v6 = vrot.slane %v699_v4, 4 }
 0x474   :  { %v691_v7 = vrot.slane %v690_v5, 2  ;;  %v701_v8 = vadd.f32 %v700_v6, %v699_v4  ;;  %v1486_v6 = vld [vmem:[%s2111_s14 + $0x5] ss:$0 sm:$0xff] }
 0x476   :  { %v692_v9 = vadd.f32 %v691_v7, %v690_v5  ;;  %v702_v10 = vrot.slane %v701_v8, 2 }
 0x478   :  { %v703_v11 = vadd.f32 %v702_v10, %v701_v8  ;;  %v693_v12 = vrot.slane %v692_v9, 1  ;;  %v76_v10 = vld [vmem:[%s2108_s11] sm:$0xff] }
 0x47a   :  { %v704_v13 = vrot.slane %v703_v11, 1  ;;  %v694_v14 = vadd.f32 %v693_v12, %v692_v9  ;;  %v1487_v9 = vld [vmem:[%s2111_s14 + $0x6] ss:$0 sm:$0xff]  ;;  %v1456_v12 = vld [vmem:[%s2108_s11 + $0x48] sm:$0xff] }
 0x47b   :  { %1658 = vmatpush3.msra.mxu0 %v1456_v12 }
 0x47c   :  { %v705_v15 = vadd.f32 %v704_v13, %v703_v11  ;;  %v706_v16 = vmul.f32 0.0625, %v694_v14  ;;  %1659 = vmatprep.subr.mxu0 %v1752_v41  ;;  %v1455_v13 = vld [vmem:[%s2108_s11 + $0x40] sm:$0xff] }
 0x47d   :  { %1660 = vmatpush3.msra.mxu0 %v1455_v13  ;;  %v2058_v14 = vld [vmem:[%s2101_s4] sm:$0x3] }
 0x47e   :  { %v707_v17 = vmul.f32 0.0625, %v705_v15  ;;  %v708_v18 = vmul.f32 %v706_v16, %v706_v16  ;;  %v710_v21 = vsub.f32 %v602_v59, %v706_v16  ;;  %v711_v22 = vsub.f32 %v603_v58, %v706_v16  ;;  %1680 = vmatprep.subr.mxu0 %v1752_v41 }
 0x47f   :  { %v749_v58 = vadd.f32 %v748_v56, %v747_v54  ;;  %v742_v59 = vrot.slane %v741_v57, 1  ;;  %vm1329_vm11 = vcmp.gt.f32.partialorder %v2058_v14, 0.0 }
 0x480   :  { %v709_v19 = vsub.f32 %v707_v17, %v708_v18 }
 0x481   :  { %v750_v60 = vrot.slane %v749_v58, 1  ;;  %v743_v61 = vadd.f32 %v742_v59, %v741_v57 }
 0x482   :  { %v712_v20 = vadd.f32 1e-05, %v709_v19 }
 0x483   :  { %v751_v62 = vadd.f32 %v750_v60, %v749_v58  ;;  %v752_v63 = vmul.f32 0.5, %v743_v61 }
 0x484   :  { %1710 = vrsqrt.f32 %v712_v20 }
 0x485   :  { %v753_v0 = vmul.f32 0.5, %v751_v62  ;;  %v754_v1 = vmul.f32 %v752_v63, %v752_v63  ;;  %v756_v4 = vsub.f32 %v53_v43, %v752_v63 }
 0x487   :  { %v755_v2 = vsub.f32 %v753_v0, %v754_v1  ;;  %v1502_v1 = vld [vmem:[%s2111_s14 + $0x8] ss:$0 sm:$0xff] }
 0x489   :  { %v757_v3 = vadd.f32 1e-05, %v755_v2 }
 0x48b   :  { %1712 = vrsqrt.f32 %v757_v3 }
 0x491   :  { %v1711_v23 = vpop.eup %1710 }
 0x492   :  { %v714_v25 = vmul.f32 %v1711_v23, %v710_v21  ;;  %v715_v26 = vmul.f32 %v1711_v23, %v711_v22 }
 0x494   :  { %v724_v28 = vmul.f32 %v722_v24, %v714_v25  ;;  %v725_v29 = vmul.f32 %v722_v24, %v715_v26  ;;  %v1491_v24 = vld [vmem:[%s2111_s14 + $0x7] ss:$0 sm:$0xff] }
 0x496   :  { %v734_v30 = vadd.f32 %v732_v27, %v724_v28  ;;  %v735_v31 = vadd.f32 %v732_v27, %v725_v29 }
 0x498   :  { %778 = vrot.lane.b32.xlu1 %v735_v31, %s1749_s25  ;;  %776 = vrot.lane.b32.xlu0 %v734_v30, %s1749_s25  ;;  %v1713_v5 = vpop.eup %1712  ;;  %v92_v30 = vld [vmem:[%s2109_s12 + $0x10] sm:$0xff]  ;;  %v91_v31 = vld [vmem:[%s2109_s12 + $0x8] sm:$0xff] }
 0x499   :  { %v759_v7 = vmul.f32 %v1713_v5, %v756_v4 }
 0x49b   :  { %v766_v8 = vmul.f32 %v1486_v6, %v759_v7 }
 0x49d   :  { %v773_v11 = vadd.f32 %v1487_v9, %v766_v8 }
 0x4b6   :  { %1084 = vxpose.xlu0.b32.start.end [1/1] (short) (narrow) %v2058_v14, 16 }
 0x4df   :  { %v609_v32 = vpop.permute.xlu0 %608  ;;  %v607_v35 = vpop.permute.xlu1 %606 }
 0x4e0   :  { %1618 = vmatpush3.msra.mxu1 %v609_v32  ;;  %v90_v32 = vld [vmem:[%s2109_s12] sm:$0xff] }
 0x4e1   :  { %1619 = vmatprep.subr.mxu1 %v1752_v41 }
 0x4e2   :  { %1620 = vmatpush3.msra.mxu1 %v607_v35 }
 0x4e3   :  { %1622 = vmatmul.mubr.msk.f32.vlgmr.msra.gmra.mxu1 %vm250_vm1, %v55_v33  ;;  %1624 = vmatprep.subr.mxu1 %v1454_v34 }
 0x4e4   :  { %1625 = vmatpush3.msra.mxu1 %v1454_v34 }
 0x4e5   :  { %1626 = vmatprep.subr.mxu1 %v1453_v36 }
 0x4e6   :  { %1627 = vmatpush3.msra.mxu1 %v1453_v36 }
 0x4e7   :  { %1628 = vmatprep.subr.mxu1 %v1452_v37 }
 0x4e8   :  { %1629 = vmatpush3.msra.mxu1 %v1452_v37 }
 0x4e9   :  { %1630 = vmatprep.subr.mxu1 %v1451_v38 }
 0x4ea   :  { %1631 = vmatpush3.msra.mxu1 %v1451_v38 }
 0x4eb   :  { %1635 = vmatprep.subr.mxu1 %v1752_v41 }
 0x50a   :  { %v1995_v39 = vpop.permute.xlu0 %776  ;;  %v1997_v42 = vpop.permute.xlu1 %778 }
 0x50b   :  { %1632 = vmatprep.mubr.msk.f32.mxu1 %vm114_vm0, %v1995_v39 }
 0x50c   :  { %1633 = vmatmul.mubr.msk.f32.vlgmr.msra.gmra.mxu1 %vm114_vm0, %v1997_v42 }
 0x50d   :  { %1636 = vmatpush3.msra.mxu1 %v1997_v42  ;;  %1639 = vmatprep.mubr.msk.f32.mxu1 %vm1753_vm4, %v1752_v41 }
 0x50e   :  { %1637 = vmatprep.subr.mxu1 %v1752_v41 }
 0x50f   :  { %1638 = vmatpush3.msra.mxu1 %v1995_v39 }
 0x510   :  { %1640 = vmatmul.mubr.msk.f32.vlgmr.msra.gmra.mxu1 %vm250_vm1, %v55_v33  ;;  %1642 = vmatprep.subr.mxu1 %v1752_v41 }
 0x511   :  { %1650 = vmatprep.mubr.msk.f32.mxu1 %vm1753_vm4, %v1752_v41  ;;  %1643 = vmatpush3.msra.mxu1 %v79_v48 }
 0x512   :  { %1644 = vmatprep.subr.mxu1 %v1752_v41 }
 0x513   :  { %1645 = vmatpush3.msra.mxu1 %v78_v49  ;;  %v1330_v49 = vlaneseq }
 0x514   :  { %1646 = vmatprep.subr.mxu1 %v1752_v41 }
 0x515   :  { %1647 = vmatpush3.msra.mxu1 %v77_v53  ;;  %v1331_v50 = vshrl.u32 %v1330_v49, 7 }
 0x516   :  { %1648 = vmatprep.subr.mxu1 %v1752_v41 }
 0x517   :  { %1649 = vmatpush3.msra.mxu1 %v76_v10  ;;  %v1332_v51 = vsub.s32 0, %v1331_v50 }
 0x518   :  { %1651 = vmatmul.mubr.msk.f32.vlgmr.msra.gmra.mxu1 %vm114_vm0, %v773_v11 }
 0x532   :  { %v1100_v23 = vpop.trf.xlu0 }
 0x533   :  { %1666 = vmatprep.mubr.msk.f32.mxu1 %vm1116_vm9, %v1100_v23 }
 0x536   :  { %v1101_v29 = vpop.trf.xlu0 }
 0x5a3   :  { %v681_v15 = vpop.f32.mrf.mxu1 }
 0x5a4   :  { %1430 = vst.msk [vmem:[#allocation2] sm:$0x3] %vm736_vm8, %v681_v15 }
 0x5a5   :  { %v1623_v16 = vpop.f32.mrf.mxu1 }
 0x5cc   :  { %v1634_v17 = vpop.f32.mrf.mxu1 }
 0x5ce   :  { %v850_v18 = vpop.f32.mrf.mxu1 }
 0x5d0   :  { %v927_v19 = vpop.f32.mrf.mxu1 }
 0x5d1   :  { %1662 = vmatmul.mubr.msk.f32.vlgmr.msra.gmra.mxu0 %vm114_vm0, %v927_v19 }
 0x5d2   :  { %1681 = vmatpush3.msra.mxu0 %v1997_v42  ;;  %v1641_v20 = vpop.f32.mrf.mxu1  ;;  %1684 = vmatprep.mubr.msk.f32.mxu0 %vm1753_vm4, %v1752_v41 }
 0x5d3   :  { %1682 = vmatprep.subr.mxu0 %v1752_v41  ;;  %v93_v41 = vld [vmem:[%s2109_s12 + $0x18] sm:$0xff] }
 0x5d4   :  { %1683 = vmatpush3.msra.mxu0 %v1995_v39 }
 0x5d8   :  { %v1006_v21 = vpop.f32.mrf.mxu1 }
 0x5d9   :  { %v1007_v25 = vadd.f32 %v1491_v24, %v1006_v21 }
 0x5da   :  { %v1652_v22 = vpop.f32.mrf.mxu1 }
 0x691   :  { %v1079_v26 = vpop.f32.mrf.mxu0 }
 0x692   :  { %v1083_v27 = vadd.f32 %v1079_v26, %v1007_v25 }
 0x693   :  { %v1663_v28 = vpop.f32.mrf.mxu0 }
 0x694   :  { %1664 = vmatprep.subr.msk.mxu1 %vm1123_vm10, %v1083_v27 }
 0x695   :  { %1665 = vmatpush3.msk.msra.mxu1 %vm1123_vm10, %v1083_v27 }
 0x696   :  { %1667 = vmatmul.mubr.msk.f32.vlgmr.msra.gmra.mxu1 %vm1116_vm9, %v1101_v29  ;;  %1669 = vmatprep.subr.mxu1 %v93_v41 }
 0x697   :  { %1670 = vmatpush3.msra.mxu1 %v93_v41 }
 0x698   :  { %1671 = vmatprep.subr.mxu1 %v92_v30 }
 0x699   :  { %1672 = vmatpush3.msra.mxu1 %v92_v30 }
 0x69a   :  { %1673 = vmatprep.subr.mxu1 %v91_v31 }
 0x69b   :  { %1674 = vmatpush3.msra.mxu1 %v91_v31 }
 0x69c   :  { %1675 = vmatprep.subr.mxu1 %v90_v32 }
 0x69d   :  { %1676 = vmatpush3.msra.mxu1 %v90_v32 }
 0x756   :  { %v1668_v33 = vpop.f32.mrf.mxu1 }
 0x757   :  { %v1199_v34 = vadd.f32 %v1668_v33, %v1634_v17 }
 0x758   :  { %v1193_v35 = vpop.f32.mrf.mxu1 }
 0x759   :  { %v1498_v36 = vmul.f32 -1.442695, %v1199_v34  ;;  %v1194_v37 = vadd.f32 %v1193_v35, %v850_v18 }
 0x75b   :  { %1714 = vpow2.f32 %v1498_v36  ;;  %v1497_v38 = vmul.f32 -1.442695, %v1194_v37 }
 0x75d   :  { %1716 = vpow2.f32 %v1497_v38 }
 0x768   :  { %v1715_v39 = vpop.eup %1714 }
 0x769   :  { %v1209_v43 = vadd.f32 1.0, %v1715_v39 }
 0x76a   :  { %v1717_v42 = vpop.eup %1716 }
 0x76b   :  { %v1208_v44 = vadd.f32 1.0, %v1717_v42 }
 0x76d   :  { %1718 = vrcp.f32 %v1208_v44 }
 0x76e   :  { %1720 = vrcp.f32 %v1209_v43 }
 0x77a   :  { %v1719_v45 = vpop.eup %1718 }
 0x77b   :  { %v1721_v46 = vpop.eup %1720  ;;  %1677 = vmatprep.mubr.msk.f32.mxu1 %vm114_vm0, %v1719_v45 }
 0x77c   :  { %1678 = vmatmul.mubr.msk.f32.vlgmr.msra.gmra.mxu1 %vm114_vm0, %v1721_v46 }
 0x83c   :  { %v1679_v47 = vpop.f32.mrf.mxu1 }
 0x83e   :  { %v1286_v48 = vpop.f32.mrf.mxu1 }
 0x83f   :  { %1295 = vxpose.xlu1.b32.start [1/2] (short) (narrow) %v1286_v48, 8 }
 0x843   :  { %1296 = vxpose.xlu1.b32.end [2/2] (short) (narrow) %v1679_v47, 8 }
 0x8bb   :  { %v1311_v52 = vpop.trf.xlu1 }
 0x8bc   :  { %v1328_v53 = vadd.f32 %v1327_v40, %v1311_v52 }
 0x8be   :  { %v1333_v54 = vrot.slane %v1328_v53, %v1332_v51 }
 0x8c0   :  { %v1334_v55 = vsel %vm1329_vm11, %v1333_v54, -1e+30 }
 0x8c1   :  { %v1336_v56 = vsel %vm1335_vm12, %v1334_v55, -inf }
 0x8c2   :  { %1337 = vmax.xlane.f32.xlu0 %v1336_v56 }
 0x94b   :  { %v1338_v57 = vpop.xlane.xlu0 %1337 }
 0x94c   :  { %v1339_v58 = vsub.f32 %v1334_v55, %v1338_v57 }
 0x94e   :  { %v1340_v59 = vmul.f32 1.442695, %v1339_v58 }
 0x950   :  { %1722 = vpow2.f32 %v1340_v59 }
 0x95d   :  { %v1723_v60 = vpop.eup %1722 }
 0x95e   :  { %v1342_v61 = vsel %vm1335_vm12, %v1723_v60, 0.0 }
 0x95f   :  { %1343 = vadd.xlane.f32.xlu1 %v1342_v61 }
 0x9e8   :  { %v1344_v62 = vpop.xlane.xlu1 %1343 }
 0x9e9   :  { %1724 = vrcp.f32 %v1344_v62 }
 0x9f6   :  { %v1725_v63 = vpop.eup %1724 }
 0x9f7   :  { %v1347_v0 = vmul.f32 %v1725_v63, %v1723_v60 }
 0x9f9   :  { %1685 = vmatmul.mubr.msk.f32.vlgmr.msra.gmra.mxu0 %vm250_vm1, %v1347_v0 }
 0xab9   :  { %v1417_v2 = vpop.f32.mrf.mxu0 }
 0xaba   :  { %vm1421_vm13 = vcmp.ge.f32.partialorder %v1417_v2, 0.0  ;;  %v1428_v3 = vmul.f32 %v1502_v1, %v1417_v2 }
 0xabb   :  { %v1686_v4 = vpop.f32.mrf.mxu0 }
 0xabc   :  { %v1429_v5 = vsel %vm1421_vm13, %v1417_v2, %v1428_v3 }
 0xabd   :  { %1432 = vrot.lane.b32.xlu0 %v1429_v5, %s1750_s6 }
 0xb2f   :  { %v1433_v6 = vpop.permute.xlu0 %1432 }
 0xb30   :  { %1436 = vst.msk [vmem:[#allocation2] sm:$0x3] %vm1435_vm14, %v1433_v6 }
 0xb31   :  { %1737 = shalt.err (!%p1734_p4)
}
 0xb32   :  { %1446 = dma.vmem_to_hbm [thread:$0]  %s1444_s24, 32, %s2112_s15, [#allocation3]  }
 0xb33   :  { %1746 = dma.done.wait [#allocation3], 32  }
 0xb34   :  { %1747 = vsyncadd [#allocation3], 4294967264 }
 0xb35   :  { %1450 = vsyncpa [#allocation3], 1 }

</bundles_post_ra>
